<compile_context>
chip_gen: v7x
topology: tpu7x:2x2x1
jax: 0.10.0
libtpu: 0.0.40
codegen_flags: <defaults>
</compile_context>

<pallas_src>
import math

import jax
import jax.numpy as jnp
from jax.experimental import pallas as pl
from jax.experimental.pallas import tpu as pltpu


def decoder_kernel(ids_ref,                                   # scalar prefetch (SMEM)
                   embed_hbm, enc_ref, h_ref,                 # inputs
                   wa_h_ref, wa_e_ref, attn_small_ref,
                   wi_e_ref, wi_c_ref, wh_ref, gi_bias_ref, bhn_ref,
                   wfc_ref, bfc_ref,
                   logits_ref, newh_ref, lse_ref,             # outputs
                   emb_scr, hc_scr, m_scr, l_scr, sem):       # scratch
    f32 = jnp.float32
    j = pl.program_id(0)
    nt = pl.num_programs(0)
    wdt = wa_h_ref.dtype                 # matmul operand dtype (bf16 or f32)
    B, T, H = enc_ref.shape

    # ---------------- grid step 0: embedding gather + attention + GRU ----------------
    @pl.when(j == 0)
    def _prologue():
        # embedding row gather straight from HBM (dropout = identity in eval)
        for b in range(B):
            pltpu.make_async_copy(embed_hbm.at[ids_ref[b]], emb_scr.at[b],
                                  sem.at[b]).start()
        for b in range(B):
            pltpu.make_async_copy(embed_hbm.at[ids_ref[b]], emb_scr.at[b],
                                  sem.at[b]).wait()

        emb = emb_scr[...].astype(wdt)                         # [B, E]
        h = h_ref[...]                                         # [B, H] f32
        h_c = h.astype(wdt)
        enc = enc_ref[...]                                     # [B, T, H] f32
        enc_c = enc.astype(wdt)

        # -------- attention (concat folded into two matmuls) --------
        ba = attn_small_ref[0:1, :]                            # [1, H]
        v = attn_small_ref[1:2, :]                             # [1, H]
        hid_proj = jnp.dot(h_c, wa_h_ref[...],
                           preferred_element_type=f32)         # [B, H]
        enc_proj = jnp.dot(enc_c.reshape(B * T, H), wa_e_ref[...],
                           preferred_element_type=f32).reshape(B, T, H)
        energy = jnp.maximum(enc_proj + hid_proj[:, None, :] + ba[None, :, :], 0.0)
        score = jnp.sum(energy * v[None, :, :], axis=-1)       # [B, T]
        smax = jnp.max(score, axis=-1, keepdims=True)
        sexp = jnp.exp(score - smax)
        attn = sexp / jnp.sum(sexp, axis=-1, keepdims=True)    # [B, T]
        # context = attn @ encoder_outputs  (batched MXU matmul, not VPU/XLU reduce)
        ctx = jnp.einsum('bqt,bth->bqh', attn[:, None, :].astype(wdt), enc_c,
                         preferred_element_type=f32)[:, 0, :]  # [B, H] f32

        # -------- GRU cell: three fused [*,3H] matmuls --------
        ctx_c = ctx.astype(wdt)
        gi = (jnp.dot(emb, wi_e_ref[...], preferred_element_type=f32)
              + jnp.dot(ctx_c, wi_c_ref[...], preferred_element_type=f32)
              + gi_bias_ref[...])                              # [B, 3H]
        gh = jnp.dot(h_c, wh_ref[...], preferred_element_type=f32)     # [B, 3H]
        r = jax.nn.sigmoid(gi[:, :H] + gh[:, :H])
        z = jax.nn.sigmoid(gi[:, H:2 * H] + gh[:, H:2 * H])
        n = jnp.tanh(gi[:, 2 * H:] + r * (gh[:, 2 * H:] + bhn_ref[...]))
        new_h = (1.0 - z) * n + z * h                          # [B, H] f32

        newh_ref[...] = new_h
        hc_scr[...] = jnp.concatenate([new_h, ctx], axis=-1).astype(wdt)
        m_scr[...] = jnp.full_like(m_scr, -jnp.inf)
        l_scr[...] = jnp.zeros_like(l_scr)

    # ---------------- every grid step: one vocab tile of fc_out + online lse ----------------
    logits = (jnp.dot(hc_scr[...], wfc_ref[...], preferred_element_type=f32)
              + bfc_ref[...])                                  # [B, TN]
    logits_ref[...] = logits

    t_max = jnp.max(logits, axis=-1, keepdims=True)
    m_new = jnp.maximum(m_scr[...], t_max)
    l_scr[...] = (l_scr[...] * jnp.exp(m_scr[...] - m_new)
                  + jnp.sum(jnp.exp(logits - m_new), axis=-1, keepdims=True))
    m_scr[...] = m_new

    @pl.when(j == nt - 1)
    def _epilogue():
        lse_ref[...] = m_scr[...] + jnp.log(l_scr[...])


def prepare_decoder_params(params, weight_dtype=jnp.bfloat16):
    """One-time weight prep (split / transpose / bias-fold / cast).

    Call ONCE before the autoregressive decode loop so no per-step XLA copies
    are generated.
    """
    H = params['W_hh'].shape[1]
    E = params['embed'].shape[1]
    O = params['b_fc'].shape[0]
    wdt = weight_dtype

    Wa = params['W_attn']                                      # [H, 2H]
    wa_h = Wa[:, :H].T.astype(wdt)                             # hidden part
    wa_e = Wa[:, H:].T.astype(wdt)                             # encoder part
    attn_small = jnp.stack([params['b_attn'], params['v']], axis=0).astype(jnp.float32)

    Wih, Whh = params['W_ih'], params['W_hh']                  # [3H, E+H], [3H, H]
    bih, bhh = params['b_ih'], params['b_hh']
    wi_e = Wih[:, :E].T.astype(wdt)                            # [E, 3H]
    wi_c = Wih[:, E:].T.astype(wdt)                            # [H, 3H]
    wh = Whh.T.astype(wdt)                                     # [H, 3H]
    # fold hidden-side biases for r, z gates into one bias; b_hh_n stays separate
    # because it sits inside r * (W_hn h + b_hn).
    gi_bias = jnp.concatenate(
        [bih[:H] + bhh[:H], bih[H:2 * H] + bhh[H:2 * H], bih[2 * H:]]
    ).reshape(1, 3 * H).astype(jnp.float32)
    bhn = bhh[2 * H:].reshape(1, H).astype(jnp.float32)

    wfc = params['W_fc'].T.astype(wdt)                         # [2H, O]
    bfc = params['b_fc'].reshape(1, O).astype(jnp.float32)

    return dict(embed=params['embed'].astype(jnp.float32),
                wa_h=wa_h, wa_e=wa_e, attn_small=attn_small,
                wi_e=wi_e, wi_c=wi_c, wh=wh, gi_bias=gi_bias, bhn=bhn,
                wfc=wfc, bfc=bfc, E=E, H=H, O=O)


def decoder_step(prepared, inputs_idx, last_hidden, encoder_outputs_bth,
                 *, tn=None, vmem_limit_bytes=32 * 1024 * 1024):
    """One decode step.

    inputs_idx:           [1, B] (or [B]) int token ids
    last_hidden:          [n_layers, B, H]
    encoder_outputs_bth:  [B, T, H]  (transpose from [T,B,H] once, outside the loop)
    Returns (log_probs [B, O], new_hidden [1, B, H]).
    """
    E, H, O = prepared['E'], prepared['H'], prepared['O']
    ids = inputs_idx.reshape(-1).astype(jnp.int32)             # [B]
    h_top = last_hidden[-1].astype(jnp.float32)                # [B, H]
    enc = encoder_outputs_bth.astype(jnp.float32)              # [B, T, H]
    B, T, _ = enc.shape

    if tn is None:
        # vocab tile: lane-dense multiple of 128; shrink on v7x (64 MiB VMEM).
        tn = O if O <= 512 else 512
    assert O % tn == 0, "output vocab must be divisible by the vocab tile"
    assert tn == O or tn % 128 == 0
    nt = O // tn

    grid_spec = pltpu.PrefetchScalarGridSpec(
        num_scalar_prefetch=1,                                 # token ids -> SMEM
        grid=(nt,),
        in_specs=[
            pl.BlockSpec(memory_space=pl.ANY),                        # embed table (HBM)
            pl.BlockSpec((B, T, H), lambda j, ids: (0, 0, 0)),        # encoder outputs
            pl.BlockSpec((B, H), lambda j, ids: (0, 0)),              # top hidden
            pl.BlockSpec((H, H), lambda j, ids: (0, 0)),              # wa_h
            pl.BlockSpec((H, H), lambda j, ids: (0, 0)),              # wa_e
            pl.BlockSpec((2, H), lambda j, ids: (0, 0)),              # [b_attn ; v]
            pl.BlockSpec((E, 3 * H), lambda j, ids: (0, 0)),          # Wi (embed part)
            pl.BlockSpec((H, 3 * H), lambda j, ids: (0, 0)),          # Wi (context part)
            pl.BlockSpec((H, 3 * H), lambda j, ids: (0, 0)),          # Wh
            pl.BlockSpec((1, 3 * H), lambda j, ids: (0, 0)),          # fused gate bias
            pl.BlockSpec((1, H), lambda j, ids: (0, 0)),              # b_hh_n
            pl.BlockSpec((2 * H, tn), lambda j, ids: (0, j)),         # fc weight tile
            pl.BlockSpec((1, tn), lambda j, ids: (0, j)),             # fc bias tile
        ],
        out_specs=[
            pl.BlockSpec((B, tn), lambda j, ids: (0, j)),             # raw logits
            pl.BlockSpec((B, H), lambda j, ids: (0, 0)),              # new hidden
            pl.BlockSpec((B, 1), lambda j, ids: (0, 0)),              # logsumexp
        ],
        scratch_shapes=[
            pltpu.VMEM((B, E), jnp.float32),                   # gathered embeddings
            pltpu.VMEM((B, 2 * H), prepared['wfc'].dtype),     # [new_h | context]
            pltpu.VMEM((B, 1), jnp.float32),                   # running max
            pltpu.VMEM((B, 1), jnp.float32),                   # running sum-exp
            pltpu.SemaphoreType.DMA((B,)),
        ],
    )

    logits, new_h, lse = pl.pallas_call(
        decoder_kernel,
        out_shape=(jax.ShapeDtypeStruct((B, O), jnp.float32),
                   jax.ShapeDtypeStruct((B, H), jnp.float32),
                   jax.ShapeDtypeStruct((B, 1), jnp.float32)),
        grid_spec=grid_spec,
        compiler_params=pltpu.CompilerParams(
            dimension_semantics=("arbitrary",),
            vmem_limit_bytes=vmem_limit_bytes,
        ),
    )(ids, prepared['embed'], enc, h_top,
      prepared['wa_h'], prepared['wa_e'], prepared['attn_small'],
      prepared['wi_e'], prepared['wi_c'], prepared['wh'],
      prepared['gi_bias'], prepared['bhn'],
      prepared['wfc'], prepared['bfc'])

    # cheap memory-bound finalize of log_softmax
    logp = logits - lse
    return logp, new_h[None]                                   # hidden: [n_layers=1, B, H]


def reference(inputs_idx, last_hidden, encoder_outputs, params):
    """Pure-JAX mirror of the PyTorch forward (explicit concats, f32)."""
    emb = params['embed'][inputs_idx]                          # [1, B, E]
    hidden = last_hidden[-1]                                   # [B, H]
    T, B, H = encoder_outputs.shape
    h_rep = jnp.broadcast_to(hidden[None], (T, B, H)).transpose(1, 0, 2)   # [B, T, H]
    enc_bt = encoder_outputs.transpose(1, 0, 2)                            # [B, T, H]
    cat = jnp.concatenate([h_rep, enc_bt], -1)                             # [B, T, 2H]
    energy = jax.nn.relu(cat @ params['W_attn'].T + params['b_attn'])      # [B, T, H]
    score = jnp.einsum('bth,h->bt', energy, params['v'])
    attn = jax.nn.softmax(score, axis=1)[:, None, :]                       # [B, 1, T]
    context = jnp.einsum('bkt,bth->bkh', attn, enc_bt)                     # [B, 1, H]
    rnn_in = jnp.concatenate([emb, context.transpose(1, 0, 2)], -1)[0]     # [B, E+H]
    gi = rnn_in @ params['W_ih'].T + params['b_ih']
    gh = hidden @ params['W_hh'].T + params['b_hh']
    r = jax.nn.sigmoid(gi[:, :H] + gh[:, :H])
    z = jax.nn.sigmoid(gi[:, H:2 * H] + gh[:, H:2 * H])
    n = jnp.tanh(gi[:, 2 * H:] + r * gh[:, 2 * H:])
    new_h = (1.0 - z) * n + z * hidden
    out = jnp.concatenate([new_h, context[:, 0, :]], 1) @ params['W_fc'].T + params['b_fc']
    return jax.nn.log_softmax(out, axis=1), new_h[None]


def init_params(key, E, H, O):
    ks = jax.random.split(key, 10)
    u = lambda k, shape, s: jax.random.uniform(k, shape, jnp.float32, -s, s)
    return dict(
        embed=jax.random.normal(ks[0], (O, E), jnp.float32),
        W_attn=u(ks[1], (H, 2 * H), 1.0 / math.sqrt(2 * H)),
        b_attn=u(ks[2], (H,), 1.0 / math.sqrt(2 * H)),
        v=u(ks[3], (H,), 1.0 / math.sqrt(H)),
        W_ih=u(ks[4], (3 * H, E + H), 1.0 / math.sqrt(H)),   # GRU in-size E+H == 3E (H = 2E)
        W_hh=u(ks[5], (3 * H, H), 1.0 / math.sqrt(H)),
        b_ih=u(ks[6], (3 * H,), 1.0 / math.sqrt(H)),
        b_hh=u(ks[7], (3 * H,), 1.0 / math.sqrt(H)),
        W_fc=u(ks[8], (O, 2 * H), 1.0 / math.sqrt(2 * H)),
        b_fc=u(ks[9], (O,), 1.0 / math.sqrt(2 * H)),
    )


if __name__ == "__main__":
    # hidden_size must equal 2 * embed_size so that GRU input (embed + context)
    # has size embed_size * 3, as the module's __init__ assumes.
    E, H, O = 16, 32, 256
    B, T, L = 2, 8, 1
    TN = 128                       # vocab tile -> 2 grid steps, exercises online lse

    key = jax.random.PRNGKey(0)
    kp, k1, k2, k3 = jax.random.split(key, 4)
    params = init_params(kp, E, H, O)

    inputs = jax.random.randint(k1, (1, B), 0, O)                   # token ids
    last_hidden = jax.random.normal(k2, (L, B, H), jnp.float32)
    encoder_outputs = jax.random.normal(k3, (T, B, H), jnp.float32)

    # one-time prep, hoisted out of the decode loop
    enc_bth = jnp.transpose(encoder_outputs, (1, 0, 2))             # [B, T, H] once
    prep_f32 = prepare_decoder_params(params, weight_dtype=jnp.float32)
    prep_bf16 = prepare_decoder_params(params, weight_dtype=jnp.bfloat16)

    ref_logp, ref_hidden = reference(inputs, last_hidden, encoder_outputs, params)

    # f32-weight path: tight correctness check
    logp32, hid32 = decoder_step(prep_f32, inputs, last_hidden, enc_bth, tn=TN)
    jax.block_until_ready((logp32, hid32))
    assert logp32.shape == (B, O) and hid32.shape == (L, B, H)
    assert jnp.allclose(logp32, ref_logp, atol=2e-4, rtol=2e-4)
    assert jnp.allclose(hid32, ref_hidden, atol=2e-4, rtol=2e-4)

    # bf16-weight / f32-accumulation performance path: looser tolerance
    logp16, hid16 = decoder_step(prep_bf16, inputs, last_hidden, enc_bth, tn=TN)
    jax.block_until_ready((logp16, hid16))
    assert jnp.allclose(logp16, ref_logp, atol=5e-2, rtol=5e-2)
    assert jnp.allclose(hid16, ref_hidden, atol=5e-2, rtol=5e-2)

    print("KERNEL_OK")
</pallas_src>

<mosaic_0001>
module attributes {stable_mosaic.version = 11 : i64} {
  func.func @decoder_kernel(%arg0: i32, %arg1: memref<2xi32, #tpu.memory_space<smem>>, %arg2: memref<256x16xf32, #tpu.memory_space<any>>, %arg3: memref<2x8x32xf32, #tpu.memory_space<vmem>>, %arg4: memref<2x32xf32, #tpu.memory_space<vmem>>, %arg5: memref<32x32xf32, #tpu.memory_space<vmem>>, %arg6: memref<32x32xf32, #tpu.memory_space<vmem>>, %arg7: memref<2x32xf32, #tpu.memory_space<vmem>>, %arg8: memref<16x96xf32, #tpu.memory_space<vmem>>, %arg9: memref<32x96xf32, #tpu.memory_space<vmem>>, %arg10: memref<32x96xf32, #tpu.memory_space<vmem>>, %arg11: memref<1x96xf32, #tpu.memory_space<vmem>>, %arg12: memref<1x32xf32, #tpu.memory_space<vmem>>, %arg13: memref<64x128xf32, #tpu.memory_space<vmem>>, %arg14: memref<1x128xf32, #tpu.memory_space<vmem>>, %arg15: memref<2x128xf32, #tpu.memory_space<vmem>>, %arg16: memref<2x32xf32, #tpu.memory_space<vmem>>, %arg17: memref<2x1xf32, #tpu.memory_space<vmem>>, %arg18: memref<2x16xf32, #tpu.memory_space<vmem>>, %arg19: memref<2x64xf32, #tpu.memory_space<vmem>>, %arg20: memref<2x1xf32, #tpu.memory_space<vmem>>, %arg21: memref<2x1xf32, #tpu.memory_space<vmem>>, %arg22: memref<2x!tpu.dma_semaphore, #tpu.memory_space<semaphore_mem>>) attributes {dimension_semantics = [#tpu.dimension_semantics<arbitrary>], iteration_bounds = array<i64: 2>, scalar_prefetch = 1 : i64, scratch_operands = 5 : i64, tpu.core_type = #tpu.core_type<tc>, window_params = [{}, {pipeline_mode = #tpu.pipeline_mode<synchronous>, transform_indices = @transform_1, window_bounds = array<i64: 2, 8, 32>}, {pipeline_mode = #tpu.pipeline_mode<synchronous>, transform_indices = @transform_2, window_bounds = array<i64: 2, 32>}, {pipeline_mode = #tpu.pipeline_mode<synchronous>, transform_indices = @transform_3, window_bounds = array<i64: 32, 32>}, {pipeline_mode = #tpu.pipeline_mode<synchronous>, transform_indices = @transform_4, window_bounds = array<i64: 32, 32>}, {pipeline_mode = #tpu.pipeline_mode<synchronous>, transform_indices = @transform_5, window_bounds = array<i64: 2, 32>}, {pipeline_mode = #tpu.pipeline_mode<synchronous>, transform_indices = @transform_6, window_bounds = array<i64: 16, 96>}, {pipeline_mode = #tpu.pipeline_mode<synchronous>, transform_indices = @transform_7, window_bounds = array<i64: 32, 96>}, {pipeline_mode = #tpu.pipeline_mode<synchronous>, transform_indices = @transform_8, window_bounds = array<i64: 32, 96>}, {pipeline_mode = #tpu.pipeline_mode<synchronous>, transform_indices = @transform_9, window_bounds = array<i64: 1, 96>}, {pipeline_mode = #tpu.pipeline_mode<synchronous>, transform_indices = @transform_10, window_bounds = array<i64: 1, 32>}, {transform_indices = @transform_11, window_bounds = array<i64: 64, 128>}, {transform_indices = @transform_12, window_bounds = array<i64: 1, 128>}, {transform_indices = @transform_13, window_bounds = array<i64: 2, 128>}, {pipeline_mode = #tpu.pipeline_mode<synchronous>, transform_indices = @transform_14, window_bounds = array<i64: 2, 32>}, {pipeline_mode = #tpu.pipeline_mode<synchronous>, transform_indices = @transform_15, window_bounds = array<i64: 2, 1>}]} {
    %c0_i32 = arith.constant 0 : i32
    %0 = arith.cmpi eq, %arg0, %c0_i32 : i32
    %1 = arith.extui %0 : i1 to i32
    %c0_i32_0 = arith.constant 0 : i32
    %2 = arith.cmpi ne, %1, %c0_i32_0 : i32
    scf.if %2 {
      %c0_21 = arith.constant 0 : index
      %30 = memref.load %arg1[%c0_21] : memref<2xi32, #tpu.memory_space<smem>>
      %c0_i32_22 = arith.constant 0 : i32
      %c0_i32_23 = arith.constant 0 : i32
      %c0_i32_24 = arith.constant 0 : i32
      %31 = tpu.memref_slice %arg2[%30, %c0_i32_24] : memref<256x16xf32, #tpu.memory_space<any>> -> memref<1x16xf32, #tpu.memory_space<any>>
      %32 = tpu.memref_squeeze %31 : memref<1x16xf32, #tpu.memory_space<any>> -> memref<16xf32, #tpu.memory_space<any>>
      %c0_i32_25 = arith.constant 0 : i32
      %33 = tpu.memref_slice %arg18[%c0_i32_22, %c0_i32_25] : memref<2x16xf32, #tpu.memory_space<vmem>> -> memref<1x16xf32, #tpu.memory_space<vmem>>
      %34 = tpu.memref_squeeze %33 : memref<1x16xf32, #tpu.memory_space<vmem>> -> memref<16xf32, #tpu.memory_space<vmem>>
      %35 = tpu.memref_slice %arg22[%c0_i32_23] : memref<2x!tpu.dma_semaphore, #tpu.memory_space<semaphore_mem>> -> memref<1x!tpu.dma_semaphore, #tpu.memory_space<semaphore_mem>>
      %36 = tpu.memref_squeeze %35 : memref<1x!tpu.dma_semaphore, #tpu.memory_space<semaphore_mem>> -> memref<!tpu.dma_semaphore, #tpu.memory_space<semaphore_mem>>
      tpu.enqueue_dma source(%32 : memref<16xf32, #tpu.memory_space<any>>) target(%34 : memref<16xf32, #tpu.memory_space<vmem>>) target_semaphore(%36 : memref<!tpu.dma_semaphore, #tpu.memory_space<semaphore_mem>>)
      %c1 = arith.constant 1 : index
      %37 = memref.load %arg1[%c1] : memref<2xi32, #tpu.memory_space<smem>>
      %c1_i32_26 = arith.constant 1 : i32
      %c1_i32_27 = arith.constant 1 : i32
      %c0_i32_28 = arith.constant 0 : i32
      %38 = tpu.memref_slice %arg2[%37, %c0_i32_28] : memref<256x16xf32, #tpu.memory_space<any>> -> memref<1x16xf32, #tpu.memory_space<any>>
      %39 = tpu.memref_squeeze %38 : memref<1x16xf32, #tpu.memory_space<any>> -> memref<16xf32, #tpu.memory_space<any>>
      %c0_i32_29 = arith.constant 0 : i32
      %40 = tpu.memref_slice %arg18[%c1_i32_26, %c0_i32_29] : memref<2x16xf32, #tpu.memory_space<vmem>> -> memref<1x16xf32, #tpu.memory_space<vmem>>
      %41 = tpu.memref_squeeze %40 : memref<1x16xf32, #tpu.memory_space<vmem>> -> memref<16xf32, #tpu.memory_space<vmem>>
      %42 = tpu.memref_slice %arg22[%c1_i32_27] : memref<2x!tpu.dma_semaphore, #tpu.memory_space<semaphore_mem>> -> memref<1x!tpu.dma_semaphore, #tpu.memory_space<semaphore_mem>>
      %43 = tpu.memref_squeeze %42 : memref<1x!tpu.dma_semaphore, #tpu.memory_space<semaphore_mem>> -> memref<!tpu.dma_semaphore, #tpu.memory_space<semaphore_mem>>
      tpu.enqueue_dma source(%39 : memref<16xf32, #tpu.memory_space<any>>) target(%41 : memref<16xf32, #tpu.memory_space<vmem>>) target_semaphore(%43 : memref<!tpu.dma_semaphore, #tpu.memory_space<semaphore_mem>>)
      %c0_30 = arith.constant 0 : index
      %44 = memref.load %arg1[%c0_30] : memref<2xi32, #tpu.memory_space<smem>>
      %c0_i32_31 = arith.constant 0 : i32
      %c0_i32_32 = arith.constant 0 : i32
      %c0_i32_33 = arith.constant 0 : i32
      %45 = tpu.memref_slice %arg2[%44, %c0_i32_33] : memref<256x16xf32, #tpu.memory_space<any>> -> memref<1x16xf32, #tpu.memory_space<any>>
      %46 = tpu.memref_squeeze %45 : memref<1x16xf32, #tpu.memory_space<any>> -> memref<16xf32, #tpu.memory_space<any>>
      %c0_i32_34 = arith.constant 0 : i32
      %47 = tpu.memref_slice %arg18[%c0_i32_31, %c0_i32_34] : memref<2x16xf32, #tpu.memory_space<vmem>> -> memref<1x16xf32, #tpu.memory_space<vmem>>
      %48 = tpu.memref_squeeze %47 : memref<1x16xf32, #tpu.memory_space<vmem>> -> memref<16xf32, #tpu.memory_space<vmem>>
      %49 = tpu.memref_slice %arg22[%c0_i32_32] : memref<2x!tpu.dma_semaphore, #tpu.memory_space<semaphore_mem>> -> memref<1x!tpu.dma_semaphore, #tpu.memory_space<semaphore_mem>>
      %50 = tpu.memref_squeeze %49 : memref<1x!tpu.dma_semaphore, #tpu.memory_space<semaphore_mem>> -> memref<!tpu.dma_semaphore, #tpu.memory_space<semaphore_mem>>
      tpu.wait_dma2 semaphore(%50 : memref<!tpu.dma_semaphore, #tpu.memory_space<semaphore_mem>>) src(%46 : memref<16xf32, #tpu.memory_space<any>>) dst(%48 : memref<16xf32, #tpu.memory_space<vmem>>)
      %c1_35 = arith.constant 1 : index
      %51 = memref.load %arg1[%c1_35] : memref<2xi32, #tpu.memory_space<smem>>
      %c1_i32_36 = arith.constant 1 : i32
      %c1_i32_37 = arith.constant 1 : i32
      %c0_i32_38 = arith.constant 0 : i32
      %52 = tpu.memref_slice %arg2[%51, %c0_i32_38] : memref<256x16xf32, #tpu.memory_space<any>> -> memref<1x16xf32, #tpu.memory_space<any>>
      %53 = tpu.memref_squeeze %52 : memref<1x16xf32, #tpu.memory_space<any>> -> memref<16xf32, #tpu.memory_space<any>>
      %c0_i32_39 = arith.constant 0 : i32
      %54 = tpu.memref_slice %arg18[%c1_i32_36, %c0_i32_39] : memref<2x16xf32, #tpu.memory_space<vmem>> -> memref<1x16xf32, #tpu.memory_space<vmem>>
      %55 = tpu.memref_squeeze %54 : memref<1x16xf32, #tpu.memory_space<vmem>> -> memref<16xf32, #tpu.memory_space<vmem>>
      %56 = tpu.memref_slice %arg22[%c1_i32_37] : memref<2x!tpu.dma_semaphore, #tpu.memory_space<semaphore_mem>> -> memref<1x!tpu.dma_semaphore, #tpu.memory_space<semaphore_mem>>
      %57 = tpu.memref_squeeze %56 : memref<1x!tpu.dma_semaphore, #tpu.memory_space<semaphore_mem>> -> memref<!tpu.dma_semaphore, #tpu.memory_space<semaphore_mem>>
      tpu.wait_dma2 semaphore(%57 : memref<!tpu.dma_semaphore, #tpu.memory_space<semaphore_mem>>) src(%53 : memref<16xf32, #tpu.memory_space<any>>) dst(%55 : memref<16xf32, #tpu.memory_space<vmem>>)
      %c0_40 = arith.constant 0 : index
      %c0_41 = arith.constant 0 : index
      %58 = vector.load %arg18[%c0_40, %c0_41] : memref<2x16xf32, #tpu.memory_space<vmem>>, vector<2x16xf32>
      %c0_42 = arith.constant 0 : index
      %c0_43 = arith.constant 0 : index
      %59 = vector.load %arg4[%c0_42, %c0_43] : memref<2x32xf32, #tpu.memory_space<vmem>>, vector<2x32xf32>
      %c0_44 = arith.constant 0 : index
      %c0_45 = arith.constant 0 : index
      %c0_46 = arith.constant 0 : index
      %60 = vector.load %arg3[%c0_44, %c0_45, %c0_46] : memref<2x8x32xf32, #tpu.memory_space<vmem>>, vector<2x8x32xf32>
      %c0_47 = arith.constant 0 : index
      %c0_48 = arith.constant 0 : index
      %61 = vector.load %arg7[%c0_47, %c0_48] : memref<2x32xf32, #tpu.memory_space<vmem>>, vector<1x32xf32>
      %c1_49 = arith.constant 1 : index
      %c0_50 = arith.constant 0 : index
      %62 = vector.load %arg7[%c1_49, %c0_50] : memref<2x32xf32, #tpu.memory_space<vmem>>, vector<1x32xf32>
      %c0_51 = arith.constant 0 : index
      %c0_52 = arith.constant 0 : index
      %63 = vector.load %arg5[%c0_51, %c0_52] : memref<32x32xf32, #tpu.memory_space<vmem>>, vector<32x32xf32>
      %cst_53 = arith.constant dense<0.000000e+00> : vector<2x32xf32>
      %64 = tpu.matmul %59, %63, %cst_53 {dimension_numbers = #tpu.dot_dimension_numbers<[1], [0], [0], [1], [0, 0, 1, 1], [], []>} : vector<2x32xf32>, vector<32x32xf32>, vector<2x32xf32> -> vector<2x32xf32>
      %65 = vector.shape_cast %60 : vector<2x8x32xf32> to vector<16x32xf32>
      %c0_54 = arith.constant 0 : index
      %c0_55 = arith.constant 0 : index
      %66 = vector.load %arg6[%c0_54, %c0_55] : memref<32x32xf32, #tpu.memory_space<vmem>>, vector<32x32xf32>
      %cst_56 = arith.constant dense<0.000000e+00> : vector<16x32xf32>
      %67 = tpu.matmul %65, %66, %cst_56 {dimension_numbers = #tpu.dot_dimension_numbers<[1], [0], [0], [1], [0, 0, 1, 1], [], []>} : vector<16x32xf32>, vector<32x32xf32>, vector<16x32xf32> -> vector<16x32xf32>
      %68 = vector.shape_cast %67 : vector<16x32xf32> to vector<2x8x32xf32>
      %69 = vector.shape_cast %64 : vector<2x32xf32> to vector<2x1x32xf32>
      %70 = vector.broadcast %69 : vector<2x1x32xf32> to vector<2x8x32xf32>
      %71 = arith.addf %68, %70 : vector<2x8x32xf32>
      %72 = vector.shape_cast %61 : vector<1x32xf32> to vector<1x1x32xf32>
      %73 = vector.broadcast %72 : vector<1x1x32xf32> to vector<2x8x32xf32>
      %74 = arith.addf %71, %73 : vector<2x8x32xf32>
      %cst_57 = arith.constant 0.000000e+00 : f32
      %75 = vector.broadcast %cst_57 : f32 to vector<2x8x32xf32>
      %76 = arith.maximumf %74, %75 : vector<2x8x32xf32>
      %77 = vector.shape_cast %62 : vector<1x32xf32> to vector<1x1x32xf32>
      %78 = vector.broadcast %77 : vector<1x1x32xf32> to vector<2x8x32xf32>
      %79 = arith.mulf %76, %78 : vector<2x8x32xf32>
      %cst_58 = arith.constant dense<0.000000e+00> : vector<2x8xf32>
      %80 = vector.multi_reduction <add>, %79, %cst_58 [2] : vector<2x8x32xf32> to vector<2x8xf32>
      %cst_59 = arith.constant dense<0xFF800000> : vector<2xf32>
      %81 = vector.multi_reduction <maximumf>, %80, %cst_59 [1] : vector<2x8xf32> to vector<2xf32>
      %82 = vector.shape_cast %81 : vector<2xf32> to vector<2x1xf32>
      %83 = vector.broadcast %82 : vector<2x1xf32> to vector<2x8xf32>
      %84 = arith.subf %80, %83 : vector<2x8xf32>
      %85 = math.exp %84 : vector<2x8xf32>
      %cst_60 = arith.constant dense<0.000000e+00> : vector<2xf32>
      %86 = vector.multi_reduction <add>, %85, %cst_60 [1] : vector<2x8xf32> to vector<2xf32>
      %87 = vector.shape_cast %86 : vector<2xf32> to vector<2x1xf32>
      %88 = vector.broadcast %87 : vector<2x1xf32> to vector<2x8xf32>
      %89 = arith.divf %85, %88 : vector<2x8xf32>
      %90 = vector.shape_cast %89 : vector<2x8xf32> to vector<2x1x8xf32>
      "tpu.trace_start"() <{level = 10 : i32, message = "bqt,bth->bqh"}> : () -> ()
      %cst_61 = arith.constant dense<0.000000e+00> : vector<2x1x32xf32>
      %91 = tpu.matmul %90, %60, %cst_61 {dimension_numbers = #tpu.dot_dimension_numbers<[2], [1], [1], [2], [0, 0, 0, 1, 1, 2], [0], [0]>} : vector<2x1x8xf32>, vector<2x8x32xf32>, vector<2x1x32xf32> -> vector<2x1x32xf32>
      "tpu.trace_stop"() : () -> ()
      %92 = vector.shape_cast %91 : vector<2x1x32xf32> to vector<2x32xf32>
      %c0_62 = arith.constant 0 : index
      %c0_63 = arith.constant 0 : index
      %93 = vector.load %arg8[%c0_62, %c0_63] : memref<16x96xf32, #tpu.memory_space<vmem>>, vector<16x96xf32>
      %cst_64 = arith.constant dense<0.000000e+00> : vector<2x96xf32>
      %94 = tpu.matmul %58, %93, %cst_64 {dimension_numbers = #tpu.dot_dimension_numbers<[1], [0], [0], [1], [0, 0, 1, 1], [], []>} : vector<2x16xf32>, vector<16x96xf32>, vector<2x96xf32> -> vector<2x96xf32>
      %c0_65 = arith.constant 0 : index
      %c0_66 = arith.constant 0 : index
      %95 = vector.load %arg9[%c0_65, %c0_66] : memref<32x96xf32, #tpu.memory_space<vmem>>, vector<32x96xf32>
      %cst_67 = arith.constant dense<0.000000e+00> : vector<2x96xf32>
      %96 = tpu.matmul %92, %95, %cst_67 {dimension_numbers = #tpu.dot_dimension_numbers<[1], [0], [0], [1], [0, 0, 1, 1], [], []>} : vector<2x32xf32>, vector<32x96xf32>, vector<2x96xf32> -> vector<2x96xf32>
      %97 = arith.addf %94, %96 : vector<2x96xf32>
      %c0_68 = arith.constant 0 : index
      %c0_69 = arith.constant 0 : index
      %98 = vector.load %arg11[%c0_68, %c0_69] : memref<1x96xf32, #tpu.memory_space<vmem>>, vector<1x96xf32>
      %99 = vector.broadcast %98 : vector<1x96xf32> to vector<2x96xf32>
      %100 = arith.addf %97, %99 : vector<2x96xf32>
      %c0_70 = arith.constant 0 : index
      %c0_71 = arith.constant 0 : index
      %101 = vector.load %arg10[%c0_70, %c0_71] : memref<32x96xf32, #tpu.memory_space<vmem>>, vector<32x96xf32>
      %cst_72 = arith.constant dense<0.000000e+00> : vector<2x96xf32>
      %102 = tpu.matmul %59, %101, %cst_72 {dimension_numbers = #tpu.dot_dimension_numbers<[1], [0], [0], [1], [0, 0, 1, 1], [], []>} : vector<2x32xf32>, vector<32x96xf32>, vector<2x96xf32> -> vector<2x96xf32>
      %103 = vector.extract_strided_slice %100 {offsets = [0, 0], sizes = [2, 32], strides = [1, 1]} : vector<2x96xf32> to vector<2x32xf32>
      %104 = vector.extract_strided_slice %102 {offsets = [0, 0], sizes = [2, 32], strides = [1, 1]} : vector<2x96xf32> to vector<2x32xf32>
      %105 = arith.addf %103, %104 : vector<2x32xf32>
      %106 = arith.negf %105 : vector<2x32xf32>
      %107 = math.exp %106 : vector<2x32xf32>
      %cst_73 = arith.constant 1.000000e+00 : f32
      %108 = vector.broadcast %cst_73 : f32 to vector<2x32xf32>
      %109 = arith.addf %108, %107 : vector<2x32xf32>
      %110 = arith.divf %108, %109 : vector<2x32xf32>
      %111 = vector.extract_strided_slice %100 {offsets = [0, 32], sizes = [2, 32], strides = [1, 1]} : vector<2x96xf32> to vector<2x32xf32>
      %112 = vector.extract_strided_slice %102 {offsets = [0, 32], sizes = [2, 32], strides = [1, 1]} : vector<2x96xf32> to vector<2x32xf32>
      %113 = arith.addf %111, %112 : vector<2x32xf32>
      %114 = arith.negf %113 : vector<2x32xf32>
      %115 = math.exp %114 : vector<2x32xf32>
      %cst_74 = arith.constant 1.000000e+00 : f32
      %116 = vector.broadcast %cst_74 : f32 to vector<2x32xf32>
      %117 = arith.addf %116, %115 : vector<2x32xf32>
      %118 = arith.divf %116, %117 : vector<2x32xf32>
      %119 = vector.extract_strided_slice %100 {offsets = [0, 64], sizes = [2, 32], strides = [1, 1]} : vector<2x96xf32> to vector<2x32xf32>
      %120 = vector.extract_strided_slice %102 {offsets = [0, 64], sizes = [2, 32], strides = [1, 1]} : vector<2x96xf32> to vector<2x32xf32>
      %c0_75 = arith.constant 0 : index
      %c0_76 = arith.constant 0 : index
      %121 = vector.load %arg12[%c0_75, %c0_76] : memref<1x32xf32, #tpu.memory_space<vmem>>, vector<1x32xf32>
      %122 = vector.broadcast %121 : vector<1x32xf32> to vector<2x32xf32>
      %123 = arith.addf %120, %122 : vector<2x32xf32>
      %124 = arith.mulf %110, %123 : vector<2x32xf32>
      %125 = arith.addf %119, %124 : vector<2x32xf32>
      %126 = math.tanh %125 : vector<2x32xf32>
      %cst_77 = arith.constant 1.000000e+00 : f32
      %127 = vector.broadcast %cst_77 : f32 to vector<2x32xf32>
      %128 = arith.subf %127, %118 : vector<2x32xf32>
      %129 = arith.mulf %128, %126 : vector<2x32xf32>
      %130 = arith.mulf %118, %59 : vector<2x32xf32>
      %131 = arith.addf %129, %130 : vector<2x32xf32>
      %c0_78 = arith.constant 0 : index
      %c0_79 = arith.constant 0 : index
      %132 = vector.load %arg16[%c0_78, %c0_79] : memref<2x32xf32, #tpu.memory_space<vmem>>, vector<2x32xf32>
      tpu.vector_store %arg16[%c0_78, %c0_79], %131 {strides = array<i32>} : memref<2x32xf32, #tpu.memory_space<vmem>>, vector<2x32xf32>,
      %133 = tpu.concatenate %131, %92 in 1 : vector<2x32xf32>, vector<2x32xf32> -> vector<2x64xf32>
      %c0_80 = arith.constant 0 : index
      %c0_81 = arith.constant 0 : index
      %134 = vector.load %arg19[%c0_80, %c0_81] : memref<2x64xf32, #tpu.memory_space<vmem>>, vector<2x64xf32>
      tpu.vector_store %arg19[%c0_80, %c0_81], %133 {strides = array<i32>} : memref<2x64xf32, #tpu.memory_space<vmem>>, vector<2x64xf32>,
      %cst_82 = arith.constant 0xFF800000 : f32
      %135 = vector.broadcast %cst_82 : f32 to vector<2x1xf32>
      %c0_83 = arith.constant 0 : index
      %c0_84 = arith.constant 0 : index
      %136 = vector.load %arg20[%c0_83, %c0_84] : memref<2x1xf32, #tpu.memory_space<vmem>>, vector<2x1xf32>
      tpu.vector_store %arg20[%c0_83, %c0_84], %135 {strides = array<i32>} : memref<2x1xf32, #tpu.memory_space<vmem>>, vector<2x1xf32>,
      %cst_85 = arith.constant 0.000000e+00 : f32
      %137 = vector.broadcast %cst_85 : f32 to vector<2x1xf32>
      %c0_86 = arith.constant 0 : index
      %c0_87 = arith.constant 0 : index
      %138 = vector.load %arg21[%c0_86, %c0_87] : memref<2x1xf32, #tpu.memory_space<vmem>>, vector<2x1xf32>
      tpu.vector_store %arg21[%c0_86, %c0_87], %137 {strides = array<i32>} : memref<2x1xf32, #tpu.memory_space<vmem>>, vector<2x1xf32>,
    } else {
    }
    %c0 = arith.constant 0 : index
    %c0_1 = arith.constant 0 : index
    %3 = vector.load %arg19[%c0, %c0_1] : memref<2x64xf32, #tpu.memory_space<vmem>>, vector<2x64xf32>
    %c0_2 = arith.constant 0 : index
    %c0_3 = arith.constant 0 : index
    %4 = vector.load %arg13[%c0_2, %c0_3] : memref<64x128xf32, #tpu.memory_space<vmem>>, vector<64x128xf32>
    %cst = arith.constant dense<0.000000e+00> : vector<2x128xf32>
    %5 = tpu.matmul %3, %4, %cst {dimension_numbers = #tpu.dot_dimension_numbers<[1], [0], [0], [1], [0, 0, 1, 1], [], []>} : vector<2x64xf32>, vector<64x128xf32>, vector<2x128xf32> -> vector<2x128xf32>
    %c0_4 = arith.constant 0 : index
    %c0_5 = arith.constant 0 : index
    %6 = vector.load %arg14[%c0_4, %c0_5] : memref<1x128xf32, #tpu.memory_space<vmem>>, vector<1x128xf32>
    %7 = vector.broadcast %6 : vector<1x128xf32> to vector<2x128xf32>
    %8 = arith.addf %5, %7 : vector<2x128xf32>
    %c0_6 = arith.constant 0 : index
    %c0_7 = arith.constant 0 : index
    %9 = vector.load %arg15[%c0_6, %c0_7] : memref<2x128xf32, #tpu.memory_space<vmem>>, vector<2x128xf32>
    tpu.vector_store %arg15[%c0_6, %c0_7], %8 {strides = array<i32>} : memref<2x128xf32, #tpu.memory_space<vmem>>, vector<2x128xf32>,
    %cst_8 = arith.constant dense<0xFF800000> : vector<2xf32>
    %10 = vector.multi_reduction <maximumf>, %8, %cst_8 [1] : vector<2x128xf32> to vector<2xf32>
    %11 = vector.shape_cast %10 : vector<2xf32> to vector<2x1xf32>
    %c0_9 = arith.constant 0 : index
    %c0_10 = arith.constant 0 : index
    %12 = vector.load %arg20[%c0_9, %c0_10] : memref<2x1xf32, #tpu.memory_space<vmem>>, vector<2x1xf32>
    %13 = arith.maximumf %12, %11 : vector<2x1xf32>
    %c0_11 = arith.constant 0 : index
    %c0_12 = arith.constant 0 : index
    %14 = vector.load %arg21[%c0_11, %c0_12] : memref<2x1xf32, #tpu.memory_space<vmem>>, vector<2x1xf32>
    %c0_13 = arith.constant 0 : index
    %c0_14 = arith.constant 0 : index
    %15 = vector.load %arg20[%c0_13, %c0_14] : memref<2x1xf32, #tpu.memory_space<vmem>>, vector<2x1xf32>
    %16 = arith.subf %15, %13 : vector<2x1xf32>
    %17 = math.exp %16 : vector<2x1xf32>
    %18 = arith.mulf %14, %17 : vector<2x1xf32>
    %19 = vector.broadcast %13 : vector<2x1xf32> to vector<2x128xf32>
    %20 = arith.subf %8, %19 : vector<2x128xf32>
    %21 = math.exp %20 : vector<2x128xf32>
    %cst_15 = arith.constant dense<0.000000e+00> : vector<2xf32>
    %22 = vector.multi_reduction <add>, %21, %cst_15 [1] : vector<2x128xf32> to vector<2xf32>
    %23 = vector.shape_cast %22 : vector<2xf32> to vector<2x1xf32>
    %24 = arith.addf %18, %23 : vector<2x1xf32>
    %c0_16 = arith.constant 0 : index
    %c0_17 = arith.constant 0 : index
    %25 = vector.load %arg21[%c0_16, %c0_17] : memref<2x1xf32, #tpu.memory_space<vmem>>, vector<2x1xf32>
    tpu.vector_store %arg21[%c0_16, %c0_17], %24 {strides = array<i32>} : memref<2x1xf32, #tpu.memory_space<vmem>>, vector<2x1xf32>,
    %c0_18 = arith.constant 0 : index
    %c0_19 = arith.constant 0 : index
    %26 = vector.load %arg20[%c0_18, %c0_19] : memref<2x1xf32, #tpu.memory_space<vmem>>, vector<2x1xf32>
    tpu.vector_store %arg20[%c0_18, %c0_19], %13 {strides = array<i32>} : memref<2x1xf32, #tpu.memory_space<vmem>>, vector<2x1xf32>,
    %c1_i32 = arith.constant 1 : i32
    %27 = arith.cmpi eq, %arg0, %c1_i32 : i32
    %28 = arith.extui %27 : i1 to i32
    %c0_i32_20 = arith.constant 0 : i32
    %29 = arith.cmpi ne, %28, %c0_i32_20 : i32
    scf.if %29 {
      %c0_21 = arith.constant 0 : index
      %c0_22 = arith.constant 0 : index
      %30 = vector.load %arg20[%c0_21, %c0_22] : memref<2x1xf32, #tpu.memory_space<vmem>>, vector<2x1xf32>
      %c0_23 = arith.constant 0 : index
      %c0_24 = arith.constant 0 : index
      %31 = vector.load %arg21[%c0_23, %c0_24] : memref<2x1xf32, #tpu.memory_space<vmem>>, vector<2x1xf32>
      %32 = math.log %31 : vector<2x1xf32>
      %33 = arith.addf %30, %32 : vector<2x1xf32>
      %c0_25 = arith.constant 0 : index
      %c0_26 = arith.constant 0 : index
      %34 = vector.load %arg17[%c0_25, %c0_26] : memref<2x1xf32, #tpu.memory_space<vmem>>, vector<2x1xf32>
      tpu.vector_store %arg17[%c0_25, %c0_26], %33 {strides = array<i32>} : memref<2x1xf32, #tpu.memory_space<vmem>>, vector<2x1xf32>,
    } else {
    }
    return
  }
  func.func @transform_1(%arg0: i32, %arg1: memref<2xi32, #tpu.memory_space<smem>>) -> (i32, i32, i32) {
    %c0_i32 = arith.constant 0 : i32
    %c0_i32_0 = arith.constant 0 : i32
    %c0_i32_1 = arith.constant 0 : i32
    %c0_i32_2 = arith.constant 0 : i32
    return %c0_i32, %c0_i32_0, %c0_i32_1 : i32, i32, i32
  }
  func.func @transform_2(%arg0: i32, %arg1: memref<2xi32, #tpu.memory_space<smem>>) -> (i32, i32) {
    %c0_i32 = arith.constant 0 : i32
    %c0_i32_0 = arith.constant 0 : i32
    %c0_i32_1 = arith.constant 0 : i32
    return %c0_i32, %c0_i32_0 : i32, i32
  }
  func.func @transform_3(%arg0: i32, %arg1: memref<2xi32, #tpu.memory_space<smem>>) -> (i32, i32) {
    %c0_i32 = arith.constant 0 : i32
    %c0_i32_0 = arith.constant 0 : i32
    %c0_i32_1 = arith.constant 0 : i32
    return %c0_i32, %c0_i32_0 : i32, i32
  }
  func.func @transform_4(%arg0: i32, %arg1: memref<2xi32, #tpu.memory_space<smem>>) -> (i32, i32) {
    %c0_i32 = arith.constant 0 : i32
    %c0_i32_0 = arith.constant 0 : i32
    %c0_i32_1 = arith.constant 0 : i32
    return %c0_i32, %c0_i32_0 : i32, i32
  }
  func.func @transform_5(%arg0: i32, %arg1: memref<2xi32, #tpu.memory_space<smem>>) -> (i32, i32) {
    %c0_i32 = arith.constant 0 : i32
    %c0_i32_0 = arith.constant 0 : i32
    %c0_i32_1 = arith.constant 0 : i32
    return %c0_i32, %c0_i32_0 : i32, i32
  }
  func.func @transform_6(%arg0: i32, %arg1: memref<2xi32, #tpu.memory_space<smem>>) -> (i32, i32) {
    %c0_i32 = arith.constant 0 : i32
    %c0_i32_0 = arith.constant 0 : i32
    %c0_i32_1 = arith.constant 0 : i32
    return %c0_i32, %c0_i32_0 : i32, i32
  }
  func.func @transform_7(%arg0: i32, %arg1: memref<2xi32, #tpu.memory_space<smem>>) -> (i32, i32) {
    %c0_i32 = arith.constant 0 : i32
    %c0_i32_0 = arith.constant 0 : i32
    %c0_i32_1 = arith.constant 0 : i32
    return %c0_i32, %c0_i32_0 : i32, i32
  }
  func.func @transform_8(%arg0: i32, %arg1: memref<2xi32, #tpu.memory_space<smem>>) -> (i32, i32) {
    %c0_i32 = arith.constant 0 : i32
    %c0_i32_0 = arith.constant 0 : i32
    %c0_i32_1 = arith.constant 0 : i32
    return %c0_i32, %c0_i32_0 : i32, i32
  }
  func.func @transform_9(%arg0: i32, %arg1: memref<2xi32, #tpu.memory_space<smem>>) -> (i32, i32) {
    %c0_i32 = arith.constant 0 : i32
    %c0_i32_0 = arith.constant 0 : i32
    %c0_i32_1 = arith.constant 0 : i32
    return %c0_i32, %c0_i32_0 : i32, i32
  }
  func.func @transform_10(%arg0: i32, %arg1: memref<2xi32, #tpu.memory_space<smem>>) -> (i32, i32) {
    %c0_i32 = arith.constant 0 : i32
    %c0_i32_0 = arith.constant 0 : i32
    %c0_i32_1 = arith.constant 0 : i32
    return %c0_i32, %c0_i32_0 : i32, i32
  }
  func.func @transform_11(%arg0: i32, %arg1: memref<2xi32, #tpu.memory_space<smem>>) -> (i32, i32) {
    %c0_i32 = arith.constant 0 : i32
    %c0_i32_0 = arith.constant 0 : i32
    return %c0_i32, %arg0 : i32, i32
  }
  func.func @transform_12(%arg0: i32, %arg1: memref<2xi32, #tpu.memory_space<smem>>) -> (i32, i32) {
    %c0_i32 = arith.constant 0 : i32
    %c0_i32_0 = arith.constant 0 : i32
    return %c0_i32, %arg0 : i32, i32
  }
  func.func @transform_13(%arg0: i32, %arg1: memref<2xi32, #tpu.memory_space<smem>>) -> (i32, i32) {
    %c0_i32 = arith.constant 0 : i32
    %c0_i32_0 = arith.constant 0 : i32
    return %c0_i32, %arg0 : i32, i32
  }
  func.func @transform_14(%arg0: i32, %arg1: memref<2xi32, #tpu.memory_space<smem>>) -> (i32, i32) {
    %c0_i32 = arith.constant 0 : i32
    %c0_i32_0 = arith.constant 0 : i32
    %c0_i32_1 = arith.constant 0 : i32
    return %c0_i32, %c0_i32_0 : i32, i32
  }
  func.func @transform_15(%arg0: i32, %arg1: memref<2xi32, #tpu.memory_space<smem>>) -> (i32, i32) {
    %c0_i32 = arith.constant 0 : i32
    %c0_i32_0 = arith.constant 0 : i32
    %c0_i32_1 = arith.constant 0 : i32
    return %c0_i32, %c0_i32_0 : i32, i32
  }
}

</mosaic_0001>

<bundles_post_ra>
// kernel: tpu_custom_call.1
= control target key start
LH: loop header
LB: loop body
LE: loop exit
PB: predicated region body
PF: predicated region fallthrough
CT: control target
= control target key end

     0   :  { %s2476_s0 = inlined_call_operand.hbm [shape: s32[2], index: 0, kind: input, shape index: {}]   ;;  %s2477_s1 = inlined_call_operand.vmem [shape: f32[256,16], index: 1, kind: input, shape index: {}]   ;;  %s2478_s2 = inlined_call_operand.vmem [shape: f32[2,8,32], index: 2, kind: input, shape index: {}]   ;;  %s2479_s3 = inlined_call_operand.vmem [shape: f32[2,32], index: 3, kind: input, shape index: {}]   ;;  %s2480_s4 = inlined_call_operand.vmem [shape: f32[32,32], index: 4, kind: input, shape index: {}]   ;;  %s2481_s5 = inlined_call_operand.vmem [shape: f32[32,32], index: 5, kind: input, shape index: {}]   ;;  %s2482_s6 = inlined_call_operand.vmem [shape: f32[2,32], index: 6, kind: input, shape index: {}]   ;;  %s2483_s7 = inlined_call_operand.vmem [shape: f32[16,96], index: 7, kind: input, shape index: {}]   ;;  %s2484_s8 = inlined_call_operand.vmem [shape: f32[32,96], index: 8, kind: input, shape index: {}]   ;;  %s2485_s9 = inlined_call_operand.vmem [shape: f32[32,96], index: 9, kind: input, shape index: {}]   ;;  %s2486_s10 = inlined_call_operand.vmem [shape: f32[1,96], index: 10, kind: input, shape index: {}]   ;;  %s2487_s11 = inlined_call_operand.vmem [shape: f32[1,32], index: 11, kind: input, shape index: {}]   ;;  %s2488_s12 = inlined_call_operand.vmem [shape: f32[64,256], index: 12, kind: input, shape index: {}]   ;;  %s2489_s13 = inlined_call_operand.vmem [shape: f32[1,256], index: 13, kind: input, shape index: {}]   ;;  %s2490_s14 = inlined_call_operand.hbm [shape: f32[2,256], index: 14, kind: output, shape index: {0}]   ;;  %s2491_s15 = inlined_call_operand.hbm [shape: f32[2,32], index: 15, kind: output, shape index: {1}]   ;;  %s2492_s16 = inlined_call_operand.vmem [shape: f32[2,1], index: 16, kind: output, shape index: {2}]  }
   0x1   :  { %2503 = sst [smem:[#allocation28_spill]] %s2476_s0 }
   0x2   :  { %2504 = sst [smem:[#allocation29_spill]] %s2486_s10  ;;  %s2507_s23 = sld [smem:[#allocation28_spill]] }
   0x3   :  { %2505 = sst [smem:[#allocation30_spill]] %s2488_s12 }
   0x4   :  { %2506 = sst [smem:[#allocation31_spill]] %s2491_s15 }
   0x8   :  { %s1951_s10 = scalar_lea.hbm %s2507_s23, 16 }
   0x9   :  { %p1952_p0 = scmp.ne.s32.totalorder %s2507_s23, %s1951_s10  ;;  %p1955_p1 = scmp.lt.u32.totalorder %s1951_s10, %s2507_s23 }
   0xb   :  { %p1957_p2 = pnand %p1955_p1, %p1952_p0 }
   0xd   :  { %1960 = shalt.err (!%p1957_p2)  }
   0xe   :  { %s2061_s28 = smov [#allocation8]  }
   0xf   :  { %23 = dma.hbm_to_smem %s2507_s23, 16, %s2061_s28, [#allocation7] }
  0x10   :  { %2031 = dma.done.wait [#allocation7], 16 }
  0x11   :  { %2032 = vsyncadd [#allocation7], 4294967280 }
  0x12   :  { %25 = sfence }
  0x13   :  { %26 = vsyncpa [#allocation11], 0 }
  0x14   :  { %28 = vsyncpa [#allocation11 + $0x1], 0 }
  0x15   :  { %29 = vsyncpa [#allocation13], 0  ;;  %s2174_s0 = smov 0   ;;  %s2176_s17 = smov 0  }
  0x16   :  { %s2178_s18 = smov 0   ;;  %s2180_s10 = smov 0  }
  0x17 LB: > { %2508 = sst [smem:[#allocation21_spill]] %s2047_s0  ;;  %s2195_s19 = sadd.s32 4294967295, %s2059_s10   ;;  %s2059_s10 = sphi %s2180_s10, %s2525_s10   ;;  %s2055_s18 = sphi %s2178_s18, %s2528_s18   ;;  %s2051_s17 = sphi %s2176_s17, %s2527_s17   ;;  %s2047_s0 = sphi %s2174_s0, %s2526_s0  }
  0x18   : > { %2509 = sst [smem:[#allocation22_spill]] %s2051_s17  ;;  %s1676_s20 = sadd.s32 4294967294, %s2059_s10  }
  0x19   : > { %2510 = sst [smem:[#allocation23_spill]] %s2055_s18  ;;  %s2199_s21 = sadd.s32 1, %s2059_s10  }
  0x1a   : > { %2511 = sst [smem:[#allocation24_spill]] %s2059_s10  ;;  %s252_s22 = sadd.s32 1, %s2055_s18 }
  0x1b   : > { %2512 = sst [smem:[#allocation25_spill]] %s2199_s21  ;;  %s249_s23 = ssub.s32 %s2059_s10, %s2199_s21 }
  0x1c   : > { %p259_p3 = scmp.ne.s32.totalorder %s2055_s18, %s2051_s17  ;;  %p250_p4 = scmp.eq.s32.totalorder %s249_s23, 0 }
  0x1d   : > { %p260_p5 = scmp.eq.s32.totalorder %s2059_s10, 0  ;;  %p315_p6 = scmp.eq.s32.totalorder %s2195_s19, 1 }
  0x1e   : > { %p320_p7 = scmp.ne.s32.totalorder %s2051_s17, %s2047_s0  ;;  %p321_p10 = scmp.eq.s32.totalorder %s1676_s20, 1 }
  0x1f   : > { %s2211_s24 = scalar_select %p250_p4, %s2055_s18, %s252_s22  }
  0x20   : > { %p261_p8 = por %p260_p5, %p259_p3  ;;  %p2215_p9 = por %p315_p6, %p259_p3 }
  0x21   : > { %2513 = sst [smem:[#allocation26_spill]] %s2211_s24  ;;  %p2219_p11 = por %p321_p10, %p320_p7 }
  0x22   : > { %p2502_p12 = scmp.ge.s32.totalorder %s2059_s10, 2 }
  0x23   : > { %s2515_s26 = scalar_select %p2219_p11, 1, 0 }
  0x24   : > { %409 = sbr.rel (%p2502_p12) target bundleno = 57 (0x39), region = 56 }
  0x25   : > { %2516 = sst [smem:[#allocation27_spill]] %s2515_s26 }
  0x2b   : > { %412 = sbr.rel (!%p261_p8) target bundleno = 57 (0x39), region = 60  ;;  %s414_s27 = sand.u32 (%p261_p8), 1, %s2055_s18  }
  0x2c   : > { %s1680_s28 = sshll.u32 (%p261_p8), %s2059_s10, 3  ;;  %s1679_s29 = sshll.u32 (%p261_p8), %s414_s27, 6 }
  0x2d   : > { %s2517_s12 = sld [smem:[#allocation30_spill]] (%p261_p8)  ;;  %s416_s20 = scalar_lea.vmem (%p261_p8), [#allocation9], %s1679_s29 }
  0x33   : > { %s418_s23 = scalar_lea.vmem %s2517_s12, %s1680_s28 }
  0x34   : > { %v460_v0 = vld [vmem:[%s418_s23] sm:$0xff]  ;;  %v462_v1 = vld [vmem:[%s418_s23 + $0x10] sm:$0xff] }
  0x35   : > { %v464_v2 = vld [vmem:[%s418_s23 + $0x20] sm:$0xff]  ;;  %461 = vst [vmem:[%s416_s20] sm:$0xff] %v460_v0  ;;  %463 = vst [vmem:[%s416_s20 + $0x8] sm:$0xff] %v462_v1  ;;  %v466_v3 = vld [vmem:[%s418_s23 + $0x30] sm:$0xff] }
  0x36   : > { %465 = vst [vmem:[%s416_s20 + $0x10] sm:$0xff] %v464_v2  ;;  %v468_v4 = vld [vmem:[%s418_s23 + $0x40] sm:$0xff]  ;;  %v470_v5 = vld [vmem:[%s418_s23 + $0x50] sm:$0xff]  ;;  %467 = vst [vmem:[%s416_s20 + $0x18] sm:$0xff] %v466_v3 }
  0x37   : > { %469 = vst [vmem:[%s416_s20 + $0x20] sm:$0xff] %v468_v4  ;;  %471 = vst [vmem:[%s416_s20 + $0x28] sm:$0xff] %v470_v5  ;;  %v472_v6 = vld [vmem:[%s418_s23 + $0x60] sm:$0xff]  ;;  %v474_v7 = vld [vmem:[%s418_s23 + $0x70] sm:$0xff] }
  0x38   : > { %473 = vst [vmem:[%s416_s20 + $0x30] sm:$0xff] %v472_v6  ;;  %475 = vst [vmem:[%s416_s20 + $0x38] sm:$0xff] %v474_v7 }
  0x39 PF: > { %p1681_p13 = scmp.ge.s32.totalorder %s2059_s10, 1  ;;  %p486_p0 = scmp.lt.s32.totalorder %s2059_s10, 3 }
  0x3b   : > { %p487_p1 = pnand %p1681_p13, %p486_p0 }
  0x3c   : > { %s2234_s27 = sand.u32 (!%p487_p1), 1, %s2051_s17   ;;  %p541_p2 = scmp.lt.s32.totalorder (!%p487_p1), %s2195_s19, 1 }
  0x3d   : > { %490 = sbr.rel (%p487_p1) target bundleno = 2633 (0xa49), region = 102  ;;  %s1682_s28 = sshll.u32 (!%p487_p1), %s2234_s27, 6 }
  0x3e   : > { %s1683_s29 = sshll.u32 (!%p487_p1), %s2234_s27, 1  ;;  %s2246_s12 = scalar_lea.vmem (!%p487_p1), [#allocation9], %s1682_s28 }
  0x3f   : > { %s2248_s24 = scalar_lea.vmem (!%p487_p1), [#allocation10], %s1683_s29  ;;  %p1684_p3 = scmp.ne.s32.totalorder (!%p487_p1), %s2195_s19, 0 }
  0x44   : > { %s2240_s30 = scalar_select %p541_p2, %s2195_s19, 1 }
  0x45   : > { %547 = sbr.rel (%p1684_p3) target bundleno = 1889 (0x761), region = 110  ;;  %s548_s18 = sld [smem:[#allocation8]] (!%p1684_p3) }
  0x46   : > { %s543_s20 = scalar_lea.vmem %s2489_s13, %s2240_s30 }
  0x4b   : > { %s549_s10 = scalar_lea.vmem (!%p1684_p3), %s2477_s1, %s548_s18 }
  0x4c   : > { %v567_v8 = vld [vmem:[%s549_s10] sm:$0x1] }
  0x4d   : > { %568 = vst [vmem:[#allocation2] sm:$0x1] %v567_v8 }
  0x4e   : > { %593 = vsyncadd [#allocation6], 16  ;;  %s1685_s26 = sld [smem:[#allocation8 + $0x1]] }
  0x54   : > { %s595_s22 = scalar_lea.vmem %s2477_s1, %s1685_s26 }
  0x55   : > { %v615_v9 = vld [vmem:[%s595_s22] sm:$0x1] }
  0x56   : > { %616 = vst [vmem:[#allocation2 + $0x1] sm:$0x1] %v615_v9 }
  0x57   : > { %641 = vsyncadd [#allocation6 + $0x1], 16 }
  0x58   : > { %2033 = dma.done.wait [#allocation6], 16 }
  0x59   : > { %2034 = vsyncadd [#allocation6], 4294967280 }
  0x5a   : > { %2035 = dma.done.wait [#allocation6 + $0x1], 16 }
  0x5b   : > { %2036 = vsyncadd [#allocation6 + $0x1], 4294967280  ;;  %vm1394_vm0 = vcmask 1024   ;;  %v2062_v10 = vmov 0.0|0.0   ;;  %vm2063_vm1 = vmmov 0   ;;  %v2064_v11 = vmov 0.0  }
  0x5c   : > { %1827 = vmatprep.subr.bf16.mxu0 %v2062_v10  ;;  %1755 = vmatprep.mubr.msk.f32.mxu0 %vm2063_vm1, %v2064_v11  ;;  %1396 = vst.msk [vmem:[#allocation5] sm:$0x3] %vm1394_vm0, %v2064_v11  ;;  %v2065_v12 = vmov -inf   ;;  %v654_v13 = vld [vmem:[%s2480_s4] sm:$0xff]  ;;  %v655_v14 = vld [vmem:[%s2480_s4 + $0x8] sm:$0xff]  ;;  %v656_v18 = vld [vmem:[%s2480_s4 + $0x10] sm:$0xff]  ;;  %v821_v30 = vlaneseq }
  0x5d   : > { %1395 = vst.msk [vmem:[#allocation4] sm:$0x3] %vm1394_vm0, %v2065_v12  ;;  %v732_v15 = vld [vmem:[%s2481_s5] sm:$0xff]  ;;  %v1828_v16 = vpack.c.bf16 %v655_v14, %v654_v13  ;;  %v733_v17 = vld [vmem:[%s2481_s5 + $0x8] sm:$0xff]  ;;  %v657_v19 = vld [vmem:[%s2480_s4 + $0x18] sm:$0xff]  ;;  %vm658_vm2 = vcmask 261120  }
  0x5e   : > { %v1833_v20 = vpack.c.bf16 %v733_v17, %v732_v15  ;;  %v734_v21 = vld [vmem:[%s2481_s5 + $0x10] sm:$0xff]  ;;  %v735_v22 = vld [vmem:[%s2481_s5 + $0x18] sm:$0xff]  ;;  %v1831_v23 = vpack.c.bf16 %v657_v19, %v656_v18  ;;  %v650_v25 = vld [vmem:[%s2478_s2] sm:$0xff]  ;;  %v2066_v28 = vmov 1966171168   ;;  %v2309_v32 = vshrl.u32 %v821_v30, 7 }
  0x5f   : > { %1829 = vmatpush3.bf16.msra.mxu0 %v1828_v16  ;;  %v1837_v24 = vpack.c.bf16 %v735_v22, %v734_v21  ;;  %1766 = vmatprep.mubr.msk.f32.mxu1 %vm658_vm2, %v650_v25  ;;  %v2293_v26 = vld [vmem:[%s2479_s3] sm:$0x3]  ;;  %v651_v27 = vld [vmem:[%s2478_s2 + $0x8] sm:$0xff]  ;;  %v819_v29 = vunpack.c.l.s4 %v2066_v28  ;;  %v875_v57 = vand.u32 127, %v821_v30  ;;  %vm884_vm3 = vcmask 1041409   ;;  %s2068_s10 = smov 64  }
  0x60   : > { %1830 = vmatprep.subr.bf16.mxu0 %v2062_v10  ;;  %1834 = vmatprep.subr.bf16.mxu1 %v1833_v20  ;;  %v842_v37 = vsub.s32 0, %v2309_v32  ;;  %v1689_v44 = vld [vmem:[%s2482_s6] ss:$0 sm:$0xff]  ;;  %v1690_v49 = vld [vmem:[%s2482_s6 + $0x1] ss:$0 sm:$0xff]  ;;  %vm887_vm4 = vcmask 58368  }
  0x61   : > { %1836 = vmatpush3.bf16.msra.mxu1 %v1833_v20  ;;  %v820_v31 = vunpack.c.0.s8 %v819_v29  ;;  %v2322_v59 = vsub.s32 %v875_v57, %v2309_v32  ;;  %v2067_v1 = vmov 0   ;;  %v898_v2 = vsub.s32 1, %v2309_v32  ;;  %v1105_v28 = vld [vmem:[%s2483_s7] sm:$0xff]  ;;  %v1106_v29 = vld [vmem:[%s2483_s7 + $0x8] sm:$0xff]  ;;  %s2518_s28 = sld [smem:[#allocation29_spill]]  ;;  %s2069_s29 = smov 96  }
  0x62   : > { %1838 = vmatprep.subr.bf16.mxu1 %v1837_v24  ;;  %1929 = vset.pattern.permute.xlu0 %v2067_v1  ;;  %vm952_vm5 = vcmask 64512   ;;  %vm1187_vm6 = vcmask 130048   ;;  %s2070_s23 = smov 32   ;;  %vm1386_vm7 = vcmask 254976   ;;  %vm1392_vm8 = vcmask 517120  }
  0x63   : > { %1832 = vmatpush3.bf16.msra.mxu0 %v1831_v23  ;;  %v823_v33 = vsub.s32 %v820_v31, %v2309_v32  ;;  %1928 = vset.pattern.permute.xlu1 %v2067_v1  ;;  %v1848_v31 = vpack.c.bf16 %v1106_v29, %v1105_v28 }
  0x64   : > { %1769 = vmatprep.subr.mxu0 %v2064_v11 }
  0x65   : > { %1840 = vmatpush3.bf16.msra.mxu1 %v1837_v24 }
  0x66   : > { %1756 = vmatmul.mubr.msk.f32.vlgmr.msra.gmra.mrb[0].mxu0 %vm658_vm2, %v2293_v26  ;;  %1774 = vmatprep.subr.mxu1 %v2064_v11 }
  0x67   : > { %1770 = vmatpush3.msra.mxu0 %v650_v25  ;;  %1771 = vmatprep.mubr.msk.f32.mxu0 %vm2063_vm1, %v2064_v11 }
  0x68   : > { %1767 = vmatmul.mubr.msk.f32.vlgmr.msra.gmra.mrb[0].mxu1 %vm658_vm2, %v651_v27  ;;  %1841 = vmatprep.subr.bf16.mxu0 %v2062_v10 }
  0x69   : > { %1775 = vmatpush3.msra.mxu1 %v651_v27  ;;  %1776 = vmatprep.mubr.msk.f32.mxu1 %vm2063_vm1, %v2064_v11 }
  0x6a   : > { %1847 = vmatprep.subr.bf16.mxu1 %v2062_v10 }
 0x139   : > { %v728_v34 = vpop.f32.mrb[0].mxu0 }
 0x13a   : > { %v824_v35 = vrot.slane %v728_v34, %v823_v33  ;;  %v1757_v36 = vpop.f32.mrb[1].mxu0  ;;  %v1270_v34 = vld [vmem:[%s2485_s9 + $0x8] sm:$0xff] }
 0x13b   : > { %v1768_v38 = vpop.f32.mrb[0].mxu1  ;;  %v1108_v36 = vld [vmem:[%s2484_s8 + $0x8] sm:$0xff] }
 0x13c   : > { %v825_v39 = vcombine.high %v824_v35, %v824_v35  ;;  %v832_v40 = vrot.slane %v824_v35, %v823_v33  ;;  %v808_v41 = vpop.f32.mrb[1].mxu1  ;;  %v1107_v35 = vld [vmem:[%s2484_s8] sm:$0xff] }
 0x13e   : > { %v839_v42 = vrot.slane %v825_v39, %v823_v33  ;;  %v843_v43 = vrot.slane %v832_v40, %v842_v37  ;;  %v1269_v33 = vld [vmem:[%s2485_s9] sm:$0xff] }
 0x13f   : > { %v1851_v39 = vpack.c.bf16 %v1270_v34, %v1269_v33 }
 0x140   : > { %v847_v45 = vrot.slane %v839_v42, %v842_v37  ;;  %v850_v46 = vadd.f32 %v843_v43, %v808_v41  ;;  %v1271_v41 = vld [vmem:[%s2485_s9 + $0x10] sm:$0xff]  ;;  %v1272_v42 = vld [vmem:[%s2485_s9 + $0x18] sm:$0xff]  ;;  %v1842_v43 = vpack.c.bf16 %v1108_v36, %v1107_v35 }
 0x142   : > { %v851_v47 = vadd.f32 %v1768_v38, %v847_v45  ;;  %v856_v48 = vadd.f32 %v1689_v44, %v850_v46  ;;  %v648_v38 = vld [vmem:[#allocation2] sm:$0x3]  ;;  %v1109_v45 = vld [vmem:[%s2484_s8 + $0x10] sm:$0xff]  ;;  %v1110_v46 = vld [vmem:[%s2484_s8 + $0x18] sm:$0xff] }
 0x144   : > { %v857_v50 = vadd.f32 %v1689_v44, %v851_v47  ;;  %v858_v51 = vmax.f32 %v856_v48, 0.0  ;;  %v1854_v44 = vpack.c.bf16 %v1272_v42, %v1271_v41  ;;  %v1845_v47 = vpack.c.bf16 %v1110_v46, %v1109_v45 }
 0x146   : > { %v859_v52 = vmax.f32 %v857_v50, 0.0  ;;  %v864_v53 = vmul.f32 %v1690_v49, %v858_v51 }
 0x148   : > { %v866_v54 = vsel %vm658_vm2, %v864_v53, 0.0  ;;  %v865_v55 = vmul.f32 %v1690_v49, %v859_v52 }
 0x149   : > { %867 = vadd.xlane.f32.xlu0 %v866_v54 }
 0x14a   : > { %v869_v56 = vsel %vm658_vm2, %v865_v55, 0.0 }
 0x14d   : > { %870 = vadd.xlane.f32.xlu0 %v869_v56 }
 0x1d6   : > { %v868_v58 = vpop.xlane.xlu0 %867 }
 0x1d7   : > { %v879_v61 = vrot.slane %v868_v58, %v2322_v59 }
 0x1da   : > { %v871_v60 = vpop.xlane.xlu0 %870 }
 0x1db   : > { %v883_v62 = vrot.slane %v871_v60, %v2322_v59 }
 0x1dd   : > { %v885_v63 = vsel %vm884_vm3, %v883_v62, %v879_v61 }
 0x1de   : > { %v888_v0 = vsel %vm887_vm4, %v885_v63, -inf }
 0x1df   : > { %889 = vmax.xlane.f32.xlu1 %v888_v0 }
 0x26c   : > { %v890_v3 = vpop.xlane.xlu1 %889 }
 0x26d   : > { %v895_v4 = vrot.slane %v890_v3, %v842_v37  ;;  %v899_v5 = vrot.slane %v890_v3, %v898_v2 }
 0x26f   : > { %v902_v6 = vsub.f32 %v868_v58, %v895_v4  ;;  %v903_v7 = vsub.f32 %v871_v60, %v899_v5  ;;  %v1695_v60 = vld [vmem:[%s2518_s28] ss:$0 sm:$0xff] }
 0x271   : > { %v904_v8 = vmul.f32 1.442695, %v902_v6  ;;  %v906_v9 = vmul.f32 1.442695, %v903_v7 }
 0x273   : > { %1930 = vpow2.f32 %v904_v8 }
 0x274   : > { %1932 = vpow2.f32 %v906_v9 }
 0x27d   : > { %v1931_v12 = vpop.eup %1930 }
 0x27e   : > { %v1933_v13 = vpop.eup %1932  ;;  %911 = vperm.xlu1 %1928, %v1931_v12  }
 0x27f   : > { %914 = vperm.xlu0 %1929, %v1933_v13  }
 0x2fd   : > { %v912_v14 = vpop.permute.xlu1 %911 }
 0x2fe   : > { %v915_v15 = vpop.permute.xlu0 %914  ;;  %v919_v16 = vrot.slane %v912_v14, %v2322_v59 }
 0x2ff   : > { %v923_v17 = vrot.slane %v915_v15, %v2322_v59 }
 0x301   : > { %v924_v18 = vsel %vm884_vm3, %v923_v17, %v919_v16 }
 0x302   : > { %v926_v19 = vsel %vm887_vm4, %v924_v18, 0.0 }
 0x303   : > { %927 = vadd.xlane.f32.xlu1 %v926_v19 }
 0x390   : > { %v928_v20 = vpop.xlane.xlu1 %927 }
 0x391   : > { %v937_v21 = vrot.slane %v928_v20, %v898_v2  ;;  %v933_v22 = vrot.slane %v928_v20, %v842_v37 }
 0x393   : > { %1934 = vrcp.f32 %v937_v21 }
 0x394   : > { %1936 = vrcp.f32 %v933_v22 }
 0x39d   : > { %v1935_v23 = vpop.eup %1934 }
 0x39e   : > { %v943_v24 = vmul.f32 %v1935_v23, %v1933_v13  ;;  %v1937_v25 = vpop.eup %1936 }
 0x39f   : > { %v941_v27 = vmul.f32 %v1937_v25, %v1931_v12 }
 0x3a0   : > { %1027 = vperm.xlu0 %1929, %v943_v24  }
 0x3a4   : > { %946 = vperm.xlu0 %1929, %v941_v27  }
 0x41f   : > { %v1028_v30 = vpop.permute.xlu0 %1027 }
 0x420   : > { %v1032_v32 = vrot.slane %v1028_v30, %v2322_v59 }
 0x422   : > { %1777 = vmatmul.mubr.msk.f32.vlgmr.msra.gmra.mrb[2].mxu1 %vm952_vm5, %v1032_v32 }
 0x423   : > { %v947_v37 = vpop.permute.xlu0 %946  ;;  %1849 = vmatpush3.bf16.msra.mxu1 %v1848_v31  ;;  %1794 = vmatprep.mubr.msk.f32.mxu1 %vm2063_vm1, %v2064_v11 }
 0x424   : > { %v951_v40 = vrot.slane %v947_v37, %v2322_v59  ;;  %1850 = vmatprep.subr.bf16.mxu1 %v2062_v10 }
 0x426   : > { %1772 = vmatmul.mubr.msk.f32.vlgmr.msra.gmra.mrb[2].mxu0 %vm952_vm5, %v951_v40  ;;  %1795 = vmatmul.mubr.msk.f32.vlgmr.msra.gmra.mrb[4].mxu1 %vm1187_vm6, %v648_v38 }
 0x427   : > { %1852 = vmatpush3.bf16.msra.mxu1 %v1851_v39  ;;  %1805 = vmatprep.mubr.msk.f32.mxu1 %vm2063_vm1, %v2064_v11 }
 0x428   : > { %1853 = vmatprep.subr.bf16.mxu1 %v2062_v10  ;;  %1843 = vmatpush3.bf16.msra.mxu0 %v1842_v43 }
 0x429   : > { %1844 = vmatprep.subr.bf16.mxu0 %v2062_v10  ;;  %1787 = vmatprep.mubr.msk.f32.mxu0 %vm2063_vm1, %v2064_v11  ;;  %v1698_v10 = vld [vmem:[%s2487_s11] ss:$0 sm:$0xff] }
 0x42a   : > { %1356 = vrot.lane.b32.xlu1 %v1698_v10, %s2068_s10 }
 0x42b   : > { %1855 = vmatpush3.bf16.msra.mxu1 %v1854_v44 }
 0x42c   : > { %1846 = vmatpush3.bf16.msra.mxu0 %v1845_v47 }
 0x42e   : > { %1806 = vmatmul.mubr.msk.f32.vlgmr.msra.gmra.mrb[6].mxu1 %vm658_vm2, %v2293_v26 }
 0x49c   : > { %v1357_v55 = vpop.permute.xlu1 %1356 }
 0x4f5   : > { %v1101_v11 = vpop.f32.mrb[2].mxu1 }
 0x4f6   : > { %v1778_v48 = vpop.f32.mrb[3].mxu1  ;;  %v1113_v49 = vrot.slane %v1101_v11, 7 }
 0x4f9   : > { %v1021_v50 = vpop.f32.mrb[2].mxu0  ;;  %v1257_v51 = vpop.f32.mrb[4].mxu1 }
 0x4fa   : > { %v1114_v52 = vsel %vm884_vm3, %v1113_v49, %v1021_v50  ;;  %v1773_v53 = vpop.f32.mrb[3].mxu0  ;;  %v1796_v54 = vpop.f32.mrb[5].mxu1 }
 0x4fb   : > { %1788 = vmatmul.mubr.msk.f32.vlgmr.msra.gmra.mrb[4].mxu0 %vm658_vm2, %v1114_v52 }
 0x501   : > { %v1339_v56 = vpop.f32.mrb[6].mxu1 }
 0x502   : > { %v1359_v57 = vadd.f32 %v1357_v55, %v1339_v56  ;;  %v1807_v58 = vpop.f32.mrb[7].mxu1 }
 0x504   : > { %1361 = vrot.lane.b32.xlu0 %v1359_v57, %s2068_s10 }
 0x576   : > { %v1362_v4 = vpop.permute.xlu0 %1361 }
 0x5ce   : > { %v1183_v59 = vpop.f32.mrb[4].mxu0 }
 0x5cf   : > { %v1258_v61 = vadd.f32 %v1257_v51, %v1183_v59  ;;  %v1789_v62 = vpop.f32.mrb[5].mxu0 }
 0x5d1   : > { %v1268_v63 = vadd.f32 %v1695_v60, %v1258_v61 }
 0x5d3   : > { %v1343_v0 = vadd.f32 %v1339_v56, %v1268_v63 }
 0x5d5   : > { %v1697_v1 = vmul.f32 -1.442695, %v1343_v0 }
 0x5d7   : > { %1938 = vpow2.f32 %v1697_v1 }
 0x5e1   : > { %v1939_v2 = vpop.eup %1938 }
 0x5e2   : > { %v1347_v3 = vadd.f32 1.0, %v1939_v2 }
 0x5e4   : > { %1940 = vrcp.f32 %v1347_v3 }
 0x5ee   : > { %v1941_v5 = vpop.eup %1940 }
 0x5ef   : > { %v1364_v6 = vmul.f32 %v1941_v5, %v1362_v4  ;;  %v1371_v13 = vsub.f32 1.0, %v1941_v5 }
 0x5f1   : > { %1366 = vrot.lane.b32.xlu0 %v1364_v6, %s2068_s10 }
 0x663   : > { %v1367_v7 = vpop.permute.xlu0 %1366 }
 0x664   : > { %v1369_v8 = vadd.f32 %v1367_v7, %v1268_v63 }
 0x666   : > { %1942 = vtanh.f32 %v1369_v8 }
 0x670   : > { %v1943_v9 = vpop.eup %1942 }
 0x671   : > { %1373 = vrot.lane.b32.xlu0 %v1943_v9, %s2069_s29 }
 0x675   : > { %1377 = vrot.lane.b32.xlu0 %v2293_v26, %s2070_s23 }
 0x679   : > { %1388 = vrot.lane.b32.xlu0 %v1114_v52, %s2070_s23 }
 0x6e3   : > { %v1374_v12 = vpop.permute.xlu0 %1373 }
 0x6e4   : > { %v1376_v15 = vmul.f32 %v1374_v12, %v1371_v13 }
 0x6e7   : > { %v1378_v14 = vpop.permute.xlu0 %1377 }
 0x6e8   : > { %v1380_v16 = vmul.f32 %v1941_v5, %v1378_v14 }
 0x6ea   : > { %v1381_v17 = vadd.f32 %v1380_v16, %v1376_v15 }
 0x6eb   : > { %v1389_v18 = vpop.permute.xlu0 %1388 }
 0x6ec   : > { %1383 = vrot.lane.b32.xlu1 %v1381_v17, %s2069_s29 }
 0x75e   : > { %v1384_v19 = vpop.permute.xlu1 %1383 }
 0x75f   : > { %1387 = vst.msk [vmem:[#allocation12] sm:$0x3] %vm1386_vm7, %v1384_v19  ;;  %v1391_v20 = vsel %vm658_vm2, %v1384_v19, %v1389_v18 }
 0x760   : > { %1393 = vst.msk [vmem:[#allocation3] sm:$0x3] %vm1392_vm8, %v1391_v20 }
 0x761 PF: > { %v1398_v26 = vld [vmem:[%s2246_s12] sm:$0xff]  ;;  %v1399_v21 = vld [vmem:[%s2246_s12 + $0x8] sm:$0xff]  ;;  %v1400_v22 = vld [vmem:[%s2246_s12 + $0x10] sm:$0xff]  ;;  %v2071_v23 = vmov 0.0|0.0   ;;  %vm2072_vm9 = vmmov 0   ;;  %v2073_v27 = vmov 0.0  }
 0x762   : > { %1856 = vmatprep.subr.bf16.mxu0 %v2071_v23  ;;  %v1857_v24 = vpack.c.bf16 %v1399_v21, %v1398_v26  ;;  %v1401_v25 = vld [vmem:[%s2246_s12 + $0x18] sm:$0xff]  ;;  %1824 = vmatprep.mubr.msk.f32.mxu0 %vm2072_vm9, %v2073_v27  ;;  %v1402_v29 = vld [vmem:[%s2246_s12 + $0x20] sm:$0xff]  ;;  %v1403_v30 = vld [vmem:[%s2246_s12 + $0x28] sm:$0xff]  ;;  %vm1413_vm10 = vcmask 523264   ;;  %vm1488_vm11 = vcmask 1041408   ;;  %v2074_v41 = vmov 0  }
 0x763   : > { %v1860_v28 = vpack.c.bf16 %v1401_v25, %v1400_v22  ;;  %v1863_v31 = vpack.c.bf16 %v1403_v30, %v1402_v29  ;;  %v1404_v32 = vld [vmem:[%s2246_s12 + $0x30] sm:$0xff]  ;;  %v1405_v33 = vld [vmem:[%s2246_s12 + $0x38] sm:$0xff]  ;;  %1944 = vset.pattern.permute.xlu0 %v2074_v41  ;;  %vm1511_vm12 = vcmask 1024   ;;  %p1701_p4 = scmp.ne.s32.totalorder %s2195_s19, 1 }
 0x764   : > { %1858 = vmatpush3.bf16.msra.mxu0 %v1857_v24  ;;  %v1866_v34 = vpack.c.bf16 %v1405_v33, %v1404_v32  ;;  %v1699_v36 = vld [vmem:[%s543_s20] ss:$0 sm:$0xff]  ;;  %v1492_v42 = vld [vmem:[#allocation4] sm:$0x3]  ;;  %v1494_v51 = vld [vmem:[#allocation5] sm:$0x3] }
 0x765   : > { %1859 = vmatprep.subr.bf16.mxu0 %v2071_v23 }
 0x767   : > { %v1397_v35 = vld [vmem:[#allocation3] sm:$0x3] }
 0x768   : > { %1861 = vmatpush3.bf16.msra.mxu0 %v1860_v28 }
 0x769   : > { %1862 = vmatprep.subr.bf16.mxu0 %v2071_v23 }
 0x76c   : > { %1864 = vmatpush3.bf16.msra.mxu0 %v1863_v31 }
 0x76d   : > { %1865 = vmatprep.subr.bf16.mxu0 %v2071_v23 }
 0x770   : > { %1867 = vmatpush3.bf16.msra.mxu0 %v1866_v34 }
 0x773   : > { %1825 = vmatmul.mubr.msk.f32.vlgmr.msra.gmra.mrb[0].mxu0 %vm1413_vm10, %v1397_v35 }
 0x846   : > { %v1483_v37 = vpop.f32.mrb[0].mxu0 }
 0x847   : > { %v1484_v38 = vadd.f32 %v1699_v36, %v1483_v37  ;;  %v1826_v39 = vpop.f32.mrb[1].mxu0 }
 0x849   : > { %1487 = vst [vmem:[%s2248_s24] sm:$0x3] %v1484_v38  ;;  %v1489_v40 = vsel %vm1488_vm11, %v1484_v38, -inf }
 0x84a   : > { %1490 = vmax.xlane.f32.xlu0 %v1489_v40 }
 0x8d7   : > { %v1491_v43 = vpop.xlane.xlu0 %1490 }
 0x8d8   : > { %v1493_v44 = vmax.f32 %v1492_v42, %v1491_v43 }
 0x8da   : > { %v1495_v45 = vsub.f32 %v1492_v42, %v1493_v44  ;;  %1513 = vst.msk [vmem:[#allocation4] sm:$0x3] %vm1511_vm12, %v1493_v44  ;;  %1501 = vperm.xlu0 %1944, %v1493_v44  }
 0x8dc   : > { %v1496_v49 = vmul.f32 1.442695, %v1495_v45 }
 0x8e1   : > { %v1518_v57 = vld [vmem:[#allocation4] sm:$0x3] (!%p1701_p4) }
 0x959   : > { %v1502_v46 = vpop.permute.xlu0 %1501 }
 0x95a   : > { %v1504_v47 = vsub.f32 %v1484_v38, %v1502_v46 }
 0x95c   : > { %v1505_v10 = vmul.f32 1.442695, %v1504_v47 }
 0x95e   : > { %1945 = vpow2.f32 %v1505_v10 }
 0x95f   : > { %1947 = vpow2.f32 %v1496_v49 }
 0x968   : > { %v1946_v11 = vpop.eup %1945 }
 0x969   : > { %v1507_v48 = vsel %vm1488_vm11, %v1946_v11, 0.0  ;;  %v1948_v50 = vpop.eup %1947 }
 0x96a   : > { %1508 = vadd.xlane.f32.xlu1 %v1507_v48  ;;  %v1498_v52 = vmul.f32 %v1948_v50, %v1494_v51 }
 0x9f4   : > { %1517 = sbr.rel (%p1701_p4) target bundleno = 2578 (0xa12), region = 174 }
 0x9f7   : > { %v1509_v53 = vpop.xlane.xlu1 %1508 }
 0x9f8   : > { %v1510_v54 = vadd.f32 %v1509_v53, %v1498_v52 }
 0x9fa   : > { %1512 = vst.msk [vmem:[#allocation5] sm:$0x3] %vm1511_vm12, %v1510_v54 }
 0xa01   : > { %v1519_v55 = vld [vmem:[#allocation5] sm:$0x3] }
 0xa02   : > { %1949 = vlog2.f32 %v1519_v55 }
 0xa0c   : > { %v1950_v56 = vpop.eup %1949 }
 0xa0d   : > { %v1521_v58 = vmul.f32 0.6931472, %v1950_v56 }
 0xa0f   : > { %v1522_v59 = vadd.f32 %v1521_v58, %v1518_v57 }
 0xa11   : > { %1523 = vst.msk [vmem:[%s2492_s16] sm:$0x3] %vm1511_vm12, %v1522_v59 }
 0xa12 PF: > { %s1703_s20 = sshll.u32 %s2195_s19, 5  ;;  %s1538_s10 = sshll.u32 %s2248_s24, 4  ;;  %s1539_s10 = int_to_ptr.vmem [resolvable:$true] %s1538_s10 }
 0xa13   : > { %s2415_s18 = scalar_lea.hbm %s2490_s14, %s1703_s20  ;;  %s1525_s21 = scalar_lea.sflag [#allocation11], %s2234_s27 }
 0xa14   : > { %s1961_s26 = scalar_lea.vmem %s1539_s10, 32  ;;  %s2075_s28 = smov [#allocation10]  }
 0xa15   : > { %p1962_p5 = scmp.ne.s32.totalorder %s1539_s10, %s1961_s26  ;;  %s1965_s29 = sshll.u32 %s2075_s28, 4  ;;  %s1966_s29 = int_to_ptr.vmem [resolvable:$false] %s1965_s29 }
 0xa16   : > { %s1967_s23 = scalar_lea.vmem %s1966_s29, 64  ;;  %p1968_p10 = scmp.lt.s32.totalorder %s1539_s10, %s1966_s29 }
 0xa17   : > { %p1963_p7 = pnand %p1962_p5, %p2215_p9  ;;  %p1969_p13 = scmp.lt.s32.totalorder %s1967_s23, %s1961_s26 }
 0xa19   : > { %p1964_p8 = pneg %p1963_p7  ;;  %p1970_p0 = por %p1969_p13, %p1968_p10 }
 0xa1b   : > { %p1971_p1 = pnand %p1970_p0, %p1964_p8 }
 0xa1d   : > { %1974 = shalt.err (!%p1971_p1)
}
 0xa1e   : > { %s1975_s24 = scalar_lea.hbm %s2415_s18, 32  ;;  %s1979_s15 = scalar_lea.hbm %s2490_s14, 64 }
 0xa1f   : > { %p1976_p2 = scmp.ne.s32.totalorder %s2415_s18, %s1975_s24  ;;  %p1980_p5 = scmp.lt.u32.totalorder %s2415_s18, %s2490_s14 }
 0xa20   : > { %p1981_p7 = scmp.lt.u32.totalorder %s1979_s15, %s1975_s24  ;;  %p1983_p10 = scmp.lt.u32.totalorder %s1975_s24, %s2415_s18 }
 0xa21   : > { %p1977_p3 = pnand %p1976_p2, %p2215_p9 }
 0xa22   : > { %p1982_p8 = por %p1981_p7, %p1980_p5 }
 0xa23   : > { %p1978_p4 = pneg %p1977_p3 }
 0xa24   : > { %p1984_p13 = por %p1983_p10, %p1982_p8 }
 0xa26   : > { %p1985_p0 = pnand %p1984_p13, %p1978_p4 }
 0xa28   : > { %1988 = shalt.err (!%p1985_p0)
}
 0xa29   : > { %1868 = dma.vmem_to_hbm [thread:$0]  (%p2215_p9), %s1539_s10, 32, %s2415_s18, %s1525_s21  }
 0xa2a   : > { %s2076_s20 = smov [#allocation12]  }
 0xa2b   : > { %s1549_s0 = sshll.u32 %s2076_s20, 4  ;;  %s1550_s0 = int_to_ptr.vmem [resolvable:$true] %s1549_s0 }
 0xa2c   : > { %s1989_s17 = scalar_lea.vmem %s1550_s0, 32  ;;  %p1996_p12 = scmp.lt.s32.totalorder %s1550_s0, %s1550_s0 }
 0xa2d   : > { %p1990_p1 = scmp.ne.s32.totalorder %s1550_s0, %s1989_s17  ;;  %p1997_p11 = scmp.lt.s32.totalorder %s1989_s17, %s1989_s17 }
 0xa2f   : > { %p1991_p2 = pnand %p1990_p1, %p315_p6  ;;  %p1998_p5 = por %p1997_p11, %p1996_p12 }
 0xa31   : > { %p1992_p3 = pneg %p1991_p2 }
 0xa33   : > { %p1999_p7 = pnand %p1998_p5, %p1992_p3 }
 0xa35   : > { %2002 = shalt.err (!%p1999_p7)
}
 0xa36   : > { %s2519_s29 = sld [smem:[#allocation31_spill]] }
 0xa3c   : > { %s2003_s25 = scalar_lea.hbm %s2519_s29, 32 }
 0xa3d   : > { %p2004_p9 = scmp.ne.s32.totalorder %s2519_s29, %s2003_s25  ;;  %p2009_p10 = scmp.lt.u32.totalorder %s2003_s25, %s2519_s29 }
 0xa3f   : > { %p2005_p4 = pnand %p2004_p9, %p315_p6 }
 0xa41   : > { %p2006_p8 = pneg %p2005_p4 }
 0xa43   : > { %p2011_p13 = pnand %p2009_p10, %p2006_p8 }
 0xa45   : > { %2014 = shalt.err (!%p2011_p13)
}
 0xa46   : > { %1870 = dma.vmem_to_hbm [thread:$0]  (%p315_p6), %s1550_s0, 32, %s2519_s29, [#allocation13]  }
 0xa47   : > { %2038 = dma.done.wait (%p315_p6), [#allocation13], 32  }
 0xa48   : > { %2040 = vsyncadd (%p315_p6), [#allocation13], 4294967264 }
 0xa49 PF: > { %s2520_s22 = sld [smem:[#allocation21_spill]]  ;;  %s2521_s15 = sld [smem:[#allocation27_spill]] }
 0xa4a   : > { %s2522_s12 = sld [smem:[#allocation24_spill]] }
 0xa4f   : > { %s1571_s30 = sand.u32 1, %s2520_s22   ;;  %p2523_p11 = scmp.ne.s32.totalorder %s2521_s15, 0 }
 0xa50   : > { %p2524_p12 = scmp.ge.s32.totalorder %s2522_s12, 2  ;;  %s1572_s20 = scalar_lea.sflag [#allocation11], %s1571_s30 }
 0xa52   : > { %p1875_p0 = pnand %p2524_p12, %p2523_p11 }
 0xa54   : > { %2042 = dma.done.wait (!%p1875_p0), %s1572_s20, 32  }
 0xa55   : > { %2044 = vsyncadd (!%p1875_p0), %s1572_s20, 4294967264  ;;  %s2525_s10 = sld [smem:[#allocation25_spill]]  ;;  %s2526_s0 = sld [smem:[#allocation22_spill]] }
 0xa56   : > { %s2527_s17 = sld [smem:[#allocation23_spill]]  ;;  %s2528_s18 = sld [smem:[#allocation26_spill]] }
 0xa5b   : > { %p32_p1 = scmp.ge.s32.totalorder %s2525_s10, 4  }
 0xa5d   :  { %34 = sbr.rel (!%p32_p1) target bundleno = 23 (0x17), region = 258 }
 0xa64   :  { %1577 = vsyncpa [#allocation11], 1 }
 0xa65   :  { %1579 = vsyncpa [#allocation11 + $0x1], 1 }
 0xa66   :  { %1580 = vsyncpa [#allocation13], 1 }
 0xa67   :  { %1581 = vsyncmov [#allocation6] }
 0xa6a   :  { %s1582_s19 = vpop.sfrf %1581 }
 0xa6b   :  { %p1708_p6 = scmp.ne.s32.totalorder %s1582_s19, 0 }
 0xa6d   :  { %1586 = shalt.err (%p1708_p6)  }
 0xa6e   :  { %1588 = vsyncmov [#allocation6 + $0x1] }
 0xa71   :  { %s1589_s26 = vpop.sfrf %1588 }
 0xa72   :  { %p1709_p2 = scmp.ne.s32.totalorder %s1589_s26, 0 }
 0xa74   :  { %1593 = shalt.err (%p1709_p2)  }

</bundles_post_ra>
